<compile_context>
chip_gen: v7x
topology: tpu7x:2x2x1
jax: 0.10.0
libtpu: 0.0.40
codegen_flags: <defaults>
</compile_context>

<pallas_src>
import math
import jax
import jax.numpy as jnp
from jax import lax
from jax.experimental import pallas as pl
from jax.experimental.pallas import tpu as pltpu


def gru_classifier_kernel(maxlen_ref,                              # scalar prefetch (SMEM)
                          x_ref, wih_ref, whh_ref, bxg_ref, bhn_ref, len_ref,
                          wfc_ref, bfc_ref, out_ref, xg_ref):
    T, BB, D = x_ref.shape
    HP = whh_ref.shape[0]            # lane-padded hidden size (multiple of 128)
    G = 3 * HP

    # ---- Phase 1: hoisted input projection for every timestep in one MXU matmul.
    #      (T*BB, D) @ (D, 3*HP), bf16 operands, f32 accumulation.
    #      bxg already contains b_ih (all gates) + b_hh (r,z gates only).
    x_all = x_ref[...].reshape(T * BB, D)
    xg = jnp.dot(x_all, wih_ref[...], preferred_element_type=jnp.float32) + bxg_ref[...]
    xg_ref[...] = xg.reshape(T, BB, G).astype(jnp.bfloat16)       # bf16 scratch

    lengths = len_ref[...]                                        # (BB, 1) int32
    b_hn = jnp.broadcast_to(bhn_ref[...], (BB, HP))               # hoisted out of step()

    # ---- Phase 2: serial GRU recurrence (only h @ W_hh left in the loop).
    def step(t, h):
        xg_t = xg_ref[t].astype(jnp.float32)                      # (BB, 3*HP)
        hg = jnp.dot(h.astype(jnp.bfloat16), whh_ref[...],
                     preferred_element_type=jnp.float32)          # (BB, 3*HP)
        rz = jax.nn.sigmoid(xg_t[:, 0:2 * HP] + hg[:, 0:2 * HP])  # one EUP slab for r,z
        r = rz[:, 0:HP]
        z = rz[:, HP:2 * HP]
        n = jnp.tanh(xg_t[:, 2 * HP:G] + r * (hg[:, 2 * HP:G] + b_hn))
        h_new = (1.0 - z) * n + z * h
        # pack_padded_sequence: only advance state while t < length[b]
        return jnp.where(lengths > t, h_new, h)

    h0 = jnp.zeros((BB, HP), jnp.float32)
    n_steps = maxlen_ref[pl.program_id(0)]                        # per-block max length
    h_T = lax.fori_loop(0, n_steps, step, h0)
    # TODO(synk): keeping W_hh resident in MXU weight regs via matmul_push_rhs is not
    # done (3*HP=384 output columns exceed a single MXU pass on v5e/v6e/v7x).

    # ---- Phase 3: fused, lane-dense classifier head (O padded to 128 in wrapper).
    out_ref[...] = (jnp.dot(h_T.astype(jnp.bfloat16), wfc_ref[...],
                            preferred_element_type=jnp.float32) + bfc_ref[...])


def _round_up(a, m):
    return -(-a // m) * m


def _pad_gate_cols(w, H, HP):
    """(K, 3H) -> (K, 3*HP): each gate block placed at a 128-lane-aligned offset."""
    K = w.shape[0]
    out = jnp.zeros((K, 3 * HP), w.dtype)
    for g in range(3):
        out = out.at[:, g * HP:g * HP + H].set(w[:, g * H:(g + 1) * H])
    return out


def _default_batch_block(B):
    # Prefer >= 2 grid blocks (dual TensorCores on v7x) with BB a multiple of 16
    # (bf16 sublane tile => free (T,BB,D)->(T*BB,D) reshape).
    for bb in (256, 128, 64, 32, 16):
        if B % bb == 0 and B // bb >= 2:
            return bb
    return B


def gru_classifier(x, lengths, w_ih_t, w_hh_t, b_ih, b_hh, w_fc_t, b_fc,
                   *, batch_block=None):
    """x: (B, T, D) f32, lengths: (B,) int. Weights pre-transposed:
       w_ih_t (D, 3H), w_hh_t (H, 3H), b_ih/b_hh (3H,), w_fc_t (H, O), b_fc (O,)."""
    B, T, D = x.shape
    H = w_hh_t.shape[0]
    O = w_fc_t.shape[1]
    HP = _round_up(H, 128)                 # lane-pad hidden
    OP = _round_up(O, 128)                 # lane-pad output (lane-dense stores)

    BB = _default_batch_block(B) if batch_block is None else batch_block
    assert B % BB == 0, "batch_block must divide B"
    assert BB == B or BB % 8 == 0, "batch_block must be a multiple of 8 (16 preferred)"
    nb = B // BB

    # ---- Sort by length (descending) so blocks are length-homogeneous; undo at the end.
    lengths = lengths.astype(jnp.int32)
    order = jnp.argsort(-lengths)
    inv = jnp.argsort(order)
    x_s = jnp.take(x, order, axis=0)
    len_s = jnp.take(lengths, order, axis=0)

    # ---- Layout plumbing in the wrapper: time-major bf16 x, lane-padded weights.
    x_tm = jnp.transpose(x_s, (1, 0, 2)).astype(jnp.bfloat16)               # (T, B, D)
    len2d = len_s.reshape(B, 1)
    block_max = jnp.minimum(jnp.max(len_s.reshape(nb, BB), axis=1), T).astype(jnp.int32)

    wih = _pad_gate_cols(w_ih_t.astype(jnp.float32), H, HP).astype(jnp.bfloat16)  # (D, 3HP)
    whh_c = _pad_gate_cols(w_hh_t.astype(jnp.float32), H, HP)                     # (H, 3HP)
    whh = jnp.zeros((HP, 3 * HP), jnp.float32).at[:H].set(whh_c).astype(jnp.bfloat16)

    # Fold b_hh for r,z gates into the Phase-1 bias; keep b_hn separate (lives inside r*(...)).
    b_rz = b_ih[:2 * H] + b_hh[:2 * H]
    bxg_full = jnp.concatenate([b_rz, b_ih[2 * H:]]).reshape(1, 3 * H)
    bxg = _pad_gate_cols(bxg_full.astype(jnp.float32), H, HP)                      # (1, 3HP)
    bhn = jnp.zeros((1, HP), jnp.float32).at[0, :H].set(b_hh[2 * H:])              # (1, HP)

    wfc = jnp.zeros((HP, OP), jnp.float32).at[:H, :O].set(
        w_fc_t.astype(jnp.float32)).astype(jnp.bfloat16)                           # (HP, OP)
    bfc = jnp.zeros((1, OP), jnp.float32).at[0, :O].set(b_fc.astype(jnp.float32))  # (1, OP)

    # ---- Explicit VMEM budget (lane/sublane-padded, bytes). Fits v5e..v7x scoped limits.
    x_bytes = 2 * T * _round_up(BB, 16) * _round_up(D, 128) * 2          # x double buffer
    xg_bytes = T * _round_up(BB, 16) * 3 * HP * 2                        # bf16 xg scratch
    w_bytes = (_round_up(D, 16) + _round_up(HP, 16)) * 3 * HP * 2 + _round_up(HP, 16) * OP * 2
    misc_bytes = 8 * _round_up(BB, 8) * 128 * 4                          # out / lens / biases
    vmem_limit = min(max(x_bytes + xg_bytes + w_bytes + misc_bytes + (4 << 20), 16 << 20),
                     48 << 20)

    out_p = pl.pallas_call(
        gru_classifier_kernel,
        out_shape=jax.ShapeDtypeStruct((B, OP), jnp.float32),
        grid_spec=pltpu.PrefetchScalarGridSpec(
            num_scalar_prefetch=1,                                  # per-block max length
            grid=(nb,),                                             # batch blocks only
            in_specs=[
                pl.BlockSpec((T, BB, D), lambda b, ml: (0, b, 0)),  # x (time-major, bf16)
                pl.BlockSpec((D, 3 * HP), lambda b, ml: (0, 0)),    # W_ih^T (resident)
                pl.BlockSpec((HP, 3 * HP), lambda b, ml: (0, 0)),   # W_hh^T (resident)
                pl.BlockSpec((1, 3 * HP), lambda b, ml: (0, 0)),    # fused b_ih (+b_hh r,z)
                pl.BlockSpec((1, HP), lambda b, ml: (0, 0)),        # b_hn
                pl.BlockSpec((BB, 1), lambda b, ml: (b, 0)),        # lengths
                pl.BlockSpec((HP, OP), lambda b, ml: (0, 0)),       # fc weight^T
                pl.BlockSpec((1, OP), lambda b, ml: (0, 0)),        # fc bias
            ],
            out_specs=pl.BlockSpec((BB, OP), lambda b, ml: (b, 0)),
            scratch_shapes=[
                pltpu.VMEM((T, BB, 3 * HP), jnp.bfloat16),          # precomputed x-gates
            ],
        ),
        compiler_params=pltpu.CompilerParams(
            dimension_semantics=("parallel",),                      # batch blocks independent
            vmem_limit_bytes=int(vmem_limit)),
    )(block_max, x_tm, wih, whh, bxg, bhn, len2d, wfc, bfc)

    # Undo the wrapper-side length sort and strip lane padding of the output.
    return jnp.take(out_p, inv, axis=0)[:, :O]


def reference_forward(x, lengths, w_ih_t, w_hh_t, b_ih, b_hh, w_fc_t, b_fc):
    """Pure-JAX reference mirroring PyTorch GRU + pack_padded_sequence semantics,
    using the same bf16-rounded matmul operands as the kernel."""
    B, T, D = x.shape
    H = w_hh_t.shape[0]
    xb = x.astype(jnp.bfloat16).astype(jnp.float32)
    wih = w_ih_t.astype(jnp.bfloat16).astype(jnp.float32)
    whh = w_hh_t.astype(jnp.bfloat16).astype(jnp.float32)
    wfc = w_fc_t.astype(jnp.bfloat16).astype(jnp.float32)
    h = jnp.zeros((B, H), jnp.float32)
    for t in range(T):
        xg = xb[:, t, :] @ wih + b_ih
        hg = h.astype(jnp.bfloat16).astype(jnp.float32) @ whh + b_hh
        r = jax.nn.sigmoid(xg[:, 0:H] + hg[:, 0:H])
        z = jax.nn.sigmoid(xg[:, H:2 * H] + hg[:, H:2 * H])
        n = jnp.tanh(xg[:, 2 * H:3 * H] + r * hg[:, 2 * H:3 * H])
        h_new = (1.0 - z) * n + z * h
        m = (lengths > t)[:, None]
        h = jnp.where(m, h_new, h)
    return h.astype(jnp.bfloat16).astype(jnp.float32) @ wfc + b_fc


if __name__ == "__main__":
    # Small shapes consistent with the module's forward (batch_first GRU).
    # B=32 so the default batch_block=16 gives 2 independent grid blocks.
    B, T, D, H, O = 32, 8, 16, 32, 8

    key = jax.random.PRNGKey(0)
    kx, kl, k1, k2, k3, k4, k5, k6 = jax.random.split(key, 8)

    x = jax.random.normal(kx, (B, T, D), dtype=jnp.float32)
    lengths = jax.random.randint(kl, (B,), 1, T + 1).astype(jnp.int32)

    # Deterministic parameter init (PyTorch-style uniform(-k, k), k = 1/sqrt(H)).
    k_gru = 1.0 / math.sqrt(H)
    w_ih = jax.random.uniform(k1, (3 * H, D), minval=-k_gru, maxval=k_gru)  # weight_ih_l0 (r,z,n)
    w_hh = jax.random.uniform(k2, (3 * H, H), minval=-k_gru, maxval=k_gru)  # weight_hh_l0
    b_ih = jax.random.uniform(k3, (3 * H,), minval=-k_gru, maxval=k_gru)
    b_hh = jax.random.uniform(k4, (3 * H,), minval=-k_gru, maxval=k_gru)
    k_fc = 1.0 / math.sqrt(H)
    w_fc = jax.random.uniform(k5, (O, H), minval=-k_fc, maxval=k_fc)        # fc.weight
    b_fc = jax.random.uniform(k6, (O,), minval=-k_fc, maxval=k_fc)          # fc.bias

    # Kernel-friendly (transposed) parameter forms.
    w_ih_t = w_ih.T                      # (D, 3H)
    w_hh_t = w_hh.T                      # (H, 3H)
    w_fc_t = w_fc.T                      # (H, O)

    out = gru_classifier(x, lengths, w_ih_t, w_hh_t, b_ih, b_hh, w_fc_t, b_fc)
    out = jax.block_until_ready(out)

    ref = reference_forward(x, lengths, w_ih_t, w_hh_t, b_ih, b_hh, w_fc_t, b_fc)
    assert out.shape == (B, O)
    assert jnp.allclose(out, ref, atol=3e-3, rtol=3e-3), "mismatch vs reference"

    # TODO(synk): bidirectional=True / num_layers>1 not implemented (module defaults used).
    print("KERNEL_OK")
</pallas_src>

<mosaic_0001>
module attributes {stable_mosaic.version = 11 : i64} {
  func.func @gru_classifier_kernel(%arg0: i32, %arg1: memref<2xi32, #tpu.memory_space<smem>>, %arg2: memref<8x16x16xbf16, #tpu.memory_space<vmem>>, %arg3: memref<16x384xbf16, #tpu.memory_space<vmem>>, %arg4: memref<128x384xbf16, #tpu.memory_space<vmem>>, %arg5: memref<1x384xf32, #tpu.memory_space<vmem>>, %arg6: memref<1x128xf32, #tpu.memory_space<vmem>>, %arg7: memref<16x1xi32, #tpu.memory_space<vmem>>, %arg8: memref<128x128xbf16, #tpu.memory_space<vmem>>, %arg9: memref<1x128xf32, #tpu.memory_space<vmem>>, %arg10: memref<16x128xf32, #tpu.memory_space<vmem>>, %arg11: memref<8x16x384xbf16, #tpu.memory_space<vmem>>) attributes {dimension_semantics = [#tpu.dimension_semantics<parallel>], iteration_bounds = array<i64: 2>, scalar_prefetch = 1 : i64, scratch_operands = 1 : i64, tpu.core_type = #tpu.core_type<tc>, window_params = [{transform_indices = @transform_0, window_bounds = array<i64: 8, 16, 16>}, {pipeline_mode = #tpu.pipeline_mode<synchronous>, transform_indices = @transform_1, window_bounds = array<i64: 16, 384>}, {pipeline_mode = #tpu.pipeline_mode<synchronous>, transform_indices = @transform_2, window_bounds = array<i64: 128, 384>}, {pipeline_mode = #tpu.pipeline_mode<synchronous>, transform_indices = @transform_3, window_bounds = array<i64: 1, 384>}, {pipeline_mode = #tpu.pipeline_mode<synchronous>, transform_indices = @transform_4, window_bounds = array<i64: 1, 128>}, {transform_indices = @transform_5, window_bounds = array<i64: 16, 1>}, {pipeline_mode = #tpu.pipeline_mode<synchronous>, transform_indices = @transform_6, window_bounds = array<i64: 128, 128>}, {pipeline_mode = #tpu.pipeline_mode<synchronous>, transform_indices = @transform_7, window_bounds = array<i64: 1, 128>}, {transform_indices = @transform_8, window_bounds = array<i64: 16, 128>}]} {
    %c0 = arith.constant 0 : index
    %c0_0 = arith.constant 0 : index
    %c0_1 = arith.constant 0 : index
    %0 = vector.load %arg2[%c0, %c0_0, %c0_1] : memref<8x16x16xbf16, #tpu.memory_space<vmem>>, vector<8x16x16xbf16>
    %1 = vector.shape_cast %0 : vector<8x16x16xbf16> to vector<128x16xbf16>
    %c0_2 = arith.constant 0 : index
    %c0_3 = arith.constant 0 : index
    %2 = vector.load %arg3[%c0_2, %c0_3] : memref<16x384xbf16, #tpu.memory_space<vmem>>, vector<16x384xbf16>
    %cst = arith.constant dense<0.000000e+00> : vector<128x384xf32>
    %3 = tpu.matmul %1, %2, %cst {dimension_numbers = #tpu.dot_dimension_numbers<[1], [0], [0], [1], [0, 0, 1, 1], [], []>} : vector<128x16xbf16>, vector<16x384xbf16>, vector<128x384xf32> -> vector<128x384xf32>
    %c0_4 = arith.constant 0 : index
    %c0_5 = arith.constant 0 : index
    %4 = vector.load %arg5[%c0_4, %c0_5] : memref<1x384xf32, #tpu.memory_space<vmem>>, vector<1x384xf32>
    %5 = vector.broadcast %4 : vector<1x384xf32> to vector<128x384xf32>
    %6 = arith.addf %3, %5 : vector<128x384xf32>
    %7 = vector.shape_cast %6 : vector<128x384xf32> to vector<8x16x384xf32>
    %8 = arith.truncf %7 : vector<8x16x384xf32> to vector<8x16x384xbf16>
    %c0_6 = arith.constant 0 : index
    %c0_7 = arith.constant 0 : index
    %c0_8 = arith.constant 0 : index
    %9 = vector.load %arg11[%c0_6, %c0_7, %c0_8] : memref<8x16x384xbf16, #tpu.memory_space<vmem>>, vector<8x16x384xbf16>
    tpu.vector_store %arg11[%c0_6, %c0_7, %c0_8], %8 {strides = array<i32>} : memref<8x16x384xbf16, #tpu.memory_space<vmem>>, vector<8x16x384xbf16>,
    %c0_9 = arith.constant 0 : index
    %c0_10 = arith.constant 0 : index
    %10 = vector.load %arg7[%c0_9, %c0_10] : memref<16x1xi32, #tpu.memory_space<vmem>>, vector<16x1xi32>
    %c0_11 = arith.constant 0 : index
    %c0_12 = arith.constant 0 : index
    %11 = vector.load %arg6[%c0_11, %c0_12] : memref<1x128xf32, #tpu.memory_space<vmem>>, vector<1x128xf32>
    %12 = vector.shape_cast %11 : vector<1x128xf32> to vector<1x128xf32>
    %13 = vector.broadcast %12 : vector<1x128xf32> to vector<16x128xf32>
    %cst_13 = arith.constant 0.000000e+00 : f32
    %14 = vector.broadcast %cst_13 : f32 to vector<16x128xf32>
    %15 = arith.index_cast %arg0 : i32 to index
    %16 = memref.load %arg1[%15] : memref<2xi32, #tpu.memory_space<smem>>
    %c0_i32 = arith.constant 0 : i32
    %17 = arith.subi %16, %c0_i32 : i32
    %18 = arith.addi %c0_i32, %17 : i32
    %c1_i32 = arith.constant 1 : i32
    %19 = scf.for %arg12 = %c0_i32 to %18 step %c1_i32 iter_args(%arg13 = %14) -> (vector<16x128xf32>)  : i32 {
      %27 = arith.index_cast %arg12 : i32 to index
      %c0_21 = arith.constant 0 : index
      %c0_22 = arith.constant 0 : index
      %28 = vector.load %arg11[%27, %c0_21, %c0_22] : memref<8x16x384xbf16, #tpu.memory_space<vmem>>, vector<1x16x384xbf16>
      %29 = vector.shape_cast %28 : vector<1x16x384xbf16> to vector<16x384xbf16>
      %30 = arith.extf %29 : vector<16x384xbf16> to vector<16x384xf32>
      %31 = arith.truncf %arg13 : vector<16x128xf32> to vector<16x128xbf16>
      %c0_23 = arith.constant 0 : index
      %c0_24 = arith.constant 0 : index
      %32 = vector.load %arg4[%c0_23, %c0_24] : memref<128x384xbf16, #tpu.memory_space<vmem>>, vector<128x384xbf16>
      %cst_25 = arith.constant dense<0.000000e+00> : vector<16x384xf32>
      %33 = tpu.matmul %31, %32, %cst_25 {dimension_numbers = #tpu.dot_dimension_numbers<[1], [0], [0], [1], [0, 0, 1, 1], [], []>} : vector<16x128xbf16>, vector<128x384xbf16>, vector<16x384xf32> -> vector<16x384xf32>
      %34 = vector.extract_strided_slice %30 {offsets = [0, 0], sizes = [16, 256], strides = [1, 1]} : vector<16x384xf32> to vector<16x256xf32>
      %35 = vector.extract_strided_slice %33 {offsets = [0, 0], sizes = [16, 256], strides = [1, 1]} : vector<16x384xf32> to vector<16x256xf32>
      %36 = arith.addf %34, %35 : vector<16x256xf32>
      %37 = arith.negf %36 : vector<16x256xf32>
      %38 = math.exp %37 : vector<16x256xf32>
      %cst_26 = arith.constant 1.000000e+00 : f32
      %39 = vector.broadcast %cst_26 : f32 to vector<16x256xf32>
      %40 = arith.addf %39, %38 : vector<16x256xf32>
      %41 = arith.divf %39, %40 : vector<16x256xf32>
      %42 = vector.extract_strided_slice %41 {offsets = [0, 0], sizes = [16, 128], strides = [1, 1]} : vector<16x256xf32> to vector<16x128xf32>
      %43 = vector.extract_strided_slice %41 {offsets = [0, 128], sizes = [16, 128], strides = [1, 1]} : vector<16x256xf32> to vector<16x128xf32>
      %44 = vector.extract_strided_slice %30 {offsets = [0, 256], sizes = [16, 128], strides = [1, 1]} : vector<16x384xf32> to vector<16x128xf32>
      %45 = vector.extract_strided_slice %33 {offsets = [0, 256], sizes = [16, 128], strides = [1, 1]} : vector<16x384xf32> to vector<16x128xf32>
      %46 = arith.addf %45, %13 : vector<16x128xf32>
      %47 = arith.mulf %42, %46 : vector<16x128xf32>
      %48 = arith.addf %44, %47 : vector<16x128xf32>
      %49 = math.tanh %48 : vector<16x128xf32>
      %cst_27 = arith.constant 1.000000e+00 : f32
      %50 = vector.broadcast %cst_27 : f32 to vector<16x128xf32>
      %51 = arith.subf %50, %43 : vector<16x128xf32>
      %52 = arith.mulf %51, %49 : vector<16x128xf32>
      %53 = arith.mulf %43, %arg13 : vector<16x128xf32>
      %54 = arith.addf %52, %53 : vector<16x128xf32>
      %55 = vector.broadcast %arg12 : i32 to vector<16x1xi32>
      %56 = arith.cmpi sgt, %10, %55 : vector<16x1xi32>
      %57 = vector.shape_cast %56 : vector<16x1xi1> to vector<16x1xi1>
      %58 = vector.broadcast %57 : vector<16x1xi1> to vector<16x128xi1>
      %59 = arith.select %58, %54, %arg13 : vector<16x128xi1>, vector<16x128xf32>
      scf.yield %59 : vector<16x128xf32>
    }
    %20 = arith.truncf %19 : vector<16x128xf32> to vector<16x128xbf16>
    %c0_14 = arith.constant 0 : index
    %c0_15 = arith.constant 0 : index
    %21 = vector.load %arg8[%c0_14, %c0_15] : memref<128x128xbf16, #tpu.memory_space<vmem>>, vector<128x128xbf16>
    %cst_16 = arith.constant dense<0.000000e+00> : vector<16x128xf32>
    %22 = tpu.matmul %20, %21, %cst_16 {dimension_numbers = #tpu.dot_dimension_numbers<[1], [0], [0], [1], [0, 0, 1, 1], [], []>} : vector<16x128xbf16>, vector<128x128xbf16>, vector<16x128xf32> -> vector<16x128xf32>
    %c0_17 = arith.constant 0 : index
    %c0_18 = arith.constant 0 : index
    %23 = vector.load %arg9[%c0_17, %c0_18] : memref<1x128xf32, #tpu.memory_space<vmem>>, vector<1x128xf32>
    %24 = vector.broadcast %23 : vector<1x128xf32> to vector<16x128xf32>
    %25 = arith.addf %22, %24 : vector<16x128xf32>
    %c0_19 = arith.constant 0 : index
    %c0_20 = arith.constant 0 : index
    %26 = vector.load %arg10[%c0_19, %c0_20] : memref<16x128xf32, #tpu.memory_space<vmem>>, vector<16x128xf32>
    tpu.vector_store %arg10[%c0_19, %c0_20], %25 {strides = array<i32>} : memref<16x128xf32, #tpu.memory_space<vmem>>, vector<16x128xf32>,
    return
  }
  func.func @transform_0(%arg0: i32, %arg1: memref<2xi32, #tpu.memory_space<smem>>) -> (i32, i32, i32) {
    %c0_i32 = arith.constant 0 : i32
    %c0_i32_0 = arith.constant 0 : i32
    %c0_i32_1 = arith.constant 0 : i32
    return %c0_i32, %arg0, %c0_i32_0 : i32, i32, i32
  }
  func.func @transform_1(%arg0: i32, %arg1: memref<2xi32, #tpu.memory_space<smem>>) -> (i32, i32) {
    %c0_i32 = arith.constant 0 : i32
    %c0_i32_0 = arith.constant 0 : i32
    %c0_i32_1 = arith.constant 0 : i32
    return %c0_i32, %c0_i32_0 : i32, i32
  }
  func.func @transform_2(%arg0: i32, %arg1: memref<2xi32, #tpu.memory_space<smem>>) -> (i32, i32) {
    %c0_i32 = arith.constant 0 : i32
    %c0_i32_0 = arith.constant 0 : i32
    %c0_i32_1 = arith.constant 0 : i32
    return %c0_i32, %c0_i32_0 : i32, i32
  }
  func.func @transform_3(%arg0: i32, %arg1: memref<2xi32, #tpu.memory_space<smem>>) -> (i32, i32) {
    %c0_i32 = arith.constant 0 : i32
    %c0_i32_0 = arith.constant 0 : i32
    %c0_i32_1 = arith.constant 0 : i32
    return %c0_i32, %c0_i32_0 : i32, i32
  }
  func.func @transform_4(%arg0: i32, %arg1: memref<2xi32, #tpu.memory_space<smem>>) -> (i32, i32) {
    %c0_i32 = arith.constant 0 : i32
    %c0_i32_0 = arith.constant 0 : i32
    %c0_i32_1 = arith.constant 0 : i32
    return %c0_i32, %c0_i32_0 : i32, i32
  }
  func.func @transform_5(%arg0: i32, %arg1: memref<2xi32, #tpu.memory_space<smem>>) -> (i32, i32) {
    %c0_i32 = arith.constant 0 : i32
    %c0_i32_0 = arith.constant 0 : i32
    return %arg0, %c0_i32 : i32, i32
  }
  func.func @transform_6(%arg0: i32, %arg1: memref<2xi32, #tpu.memory_space<smem>>) -> (i32, i32) {
    %c0_i32 = arith.constant 0 : i32
    %c0_i32_0 = arith.constant 0 : i32
    %c0_i32_1 = arith.constant 0 : i32
    return %c0_i32, %c0_i32_0 : i32, i32
  }
  func.func @transform_7(%arg0: i32, %arg1: memref<2xi32, #tpu.memory_space<smem>>) -> (i32, i32) {
    %c0_i32 = arith.constant 0 : i32
    %c0_i32_0 = arith.constant 0 : i32
    %c0_i32_1 = arith.constant 0 : i32
    return %c0_i32, %c0_i32_0 : i32, i32
  }
  func.func @transform_8(%arg0: i32, %arg1: memref<2xi32, #tpu.memory_space<smem>>) -> (i32, i32) {
    %c0_i32 = arith.constant 0 : i32
    %c0_i32_0 = arith.constant 0 : i32
    return %arg0, %c0_i32 : i32, i32
  }
}

</mosaic_0001>

<bundles_post_ra>
// kernel: tpu_custom_call.1
= control target key start
LH: loop header
LB: loop body
LE: loop exit
PB: predicated region body
PF: predicated region fallthrough
CT: control target
= control target key end

     0   :  { %s2365_s0 = inlined_call_operand.vmem [shape: s32[2], index: 0, kind: input, shape index: {}]   ;;  %s2366_s1 = inlined_call_operand.vmem [shape: bf16[8,32,16], index: 1, kind: input, shape index: {}]   ;;  %s2367_s2 = inlined_call_operand.vmem [shape: bf16[16,384], index: 2, kind: input, shape index: {}]   ;;  %s2368_s3 = inlined_call_operand.vmem [shape: bf16[128,384], index: 3, kind: input, shape index: {}]   ;;  %s2369_s4 = inlined_call_operand.vmem [shape: f32[1,384], index: 4, kind: input, shape index: {}]   ;;  %s2370_s5 = inlined_call_operand.vmem [shape: f32[1,128], index: 5, kind: input, shape index: {}]   ;;  %s2371_s6 = inlined_call_operand.vmem [shape: s32[32,1], index: 6, kind: input, shape index: {}]   ;;  %s2372_s7 = inlined_call_operand.hbm [shape: bf16[128,128], index: 7, kind: input, shape index: {}]   ;;  %s2373_s8 = inlined_call_operand.vmem [shape: f32[1,128], index: 8, kind: input, shape index: {}]   ;;  %s2374_s9 = inlined_call_operand.hbm [shape: f32[32,128], index: 9, kind: output, shape index: {}]  }
   0x1   :  { %2378 = sst [smem:[#allocation13_spill]] %s2366_s1  ;;  %s14_s11 = sshll.u32 %s2365_s0, 4  ;;  %s15_s11 = int_to_ptr.vmem [resolvable:$true] %s14_s11 }
   0x2   :  { %s1746_s12 = scalar_lea.vmem %s15_s11, 16  ;;  %p1751_p1 = scmp.lt.s32.totalorder %s15_s11, %s15_s11 }
   0x3   :  { %p1747_p0 = scmp.ne.s32.totalorder %s15_s11, %s1746_s12  ;;  %p1752_p2 = scmp.lt.s32.totalorder %s1746_s12, %s1746_s12 }
   0x5   :  { %p1753_p3 = por %p1752_p2, %p1751_p1 }
   0x7   :  { %p1754_p4 = pnand %p1753_p3, %p1747_p0 }
   0x9   :  { %1757 = shalt.err (!%p1754_p4)  }
   0xa   :  { %s1896_s13 = smov [#allocation4]  }
   0xb   :  { %17 = dma.vmem_to_smem %s15_s11, 16, %s1896_s13, [#allocation3] }
   0xc   :  { %1850 = dma.done.wait [#allocation3], 16 }
   0xd   :  { %1851 = vsyncadd [#allocation3], 4294967280 }
   0xe   :  { %19 = sfence }
   0xf   :  { %20 = vsyncpa [#allocation7], 0 }
  0x10   :  { %21 = vsyncpa [#allocation8], 0 }
  0x11   :  { %23 = vsyncpa [#allocation8 + $0x1], 0  ;;  %s1962_s14 = smov 0   ;;  %s1964_s15 = smov 0  }
  0x12   :  { %s1966_s0 = smov 0   ;;  %s1968_s16 = smov 0  }
  0x13 LB: > { %s1983_s17 = sadd.s32 4294967295, %s1874_s16   ;;  %s1397_s18 = sadd.s32 4294967294, %s1874_s16   ;;  %s1874_s16 = sphi %s1968_s16, %s2399_s16   ;;  %s1870_s0 = sphi %s1966_s0, %s2398_s0   ;;  %s1866_s15 = sphi %s1964_s15, %s2397_s15   ;;  %s1862_s14 = sphi %s1962_s14, %s2396_s14  }
  0x14   : > { %s1987_s19 = sadd.s32 1, %s1874_s16   ;;  %s36_s20 = sadd.s32 1, %s1870_s0 }
  0x15   : > { %s33_s21 = ssub.s32 %s1874_s16, %s1987_s19  ;;  %p43_p5 = scmp.ne.s32.totalorder %s1870_s0, %s1866_s15 }
  0x16   : > { %p34_p6 = scmp.eq.s32.totalorder %s33_s21, 0  ;;  %p44_p7 = scmp.eq.s32.totalorder %s1874_s16, 0 }
  0x17   : > { %p225_p8 = scmp.eq.s32.totalorder %s1983_s17, 1  ;;  %p230_p9 = scmp.ne.s32.totalorder %s1866_s15, %s1862_s14 }
  0x18   : > { %s1999_s22 = scalar_select %p34_p6, %s1870_s0, %s36_s20  }
  0x19   : > { %p2001_p10 = por %p44_p7, %p43_p5  ;;  %p2005_p11 = por %p225_p8, %p43_p5 }
  0x1a   : > { %p231_p12 = scmp.eq.s32.totalorder %s1397_s18, 1  ;;  %p1398_p13 = scmp.ge.s32.totalorder %s1874_s16, 1 }
  0x1b   : > { %s2379_s23 = scalar_select %p2001_p10, 1, 0 }
  0x1c   : > { %s2380_s24 = scalar_select %p2005_p11, 1, 0 }
  0x1d   : > { %p238_p0 = scmp.lt.s32.totalorder %s1874_s16, 3  ;;  %p2011_p1 = por %p231_p12, %p230_p9 }
  0x1e   : > { %p2375_p2 = scmp.eq.s32.totalorder %s1983_s17, 0  ;;  %s1897_s27 = smov [#allocation6]  }
  0x1f   : > { %s2381_s25 = scalar_select %p2011_p1, 1, 0 }
  0x20   : > { %p2016_p3 = pnand %p1398_p13, %p238_p0  ;;  %s262_s28 = sshll.u32 %s1897_s27, 4  ;;  %s263_s28 = int_to_ptr.vmem [resolvable:$true] %s262_s28 }
  0x21   : > { %s1758_s11 = scalar_lea.hbm %s2372_s7, 1024 }
  0x22   : > { %s2382_s26 = scalar_select %p2016_p3, 1, 0 }
  0x23   : > { %p1578_p4 = pneg %p2016_p3  ;;  %p1759_p6 = scmp.ne.s32.totalorder %s2372_s7, %s1758_s11 }
  0x24   : > { %p1765_p12 = scmp.lt.u32.totalorder %s1758_s11, %s2372_s7 }
  0x25   : > { %p2024_p5 = pnand %p2375_p2, %p1578_p4 }
  0x27   : > { %p1760_p7 = pneg %p2024_p5 }
  0x29   : > { %p1761_p8 = pnand %p1760_p7, %p1759_p6 }
  0x2b   : > { %p1762_p9 = pneg %p1761_p8 }
  0x2d   : > { %p1767_p13 = pnand %p1765_p12, %p1762_p9 }
  0x2f   : > { %1770 = shalt.err (!%p1767_p13)
}
  0x30   : > { %s1771_s21 = scalar_lea.vmem %s263_s28, 1024  ;;  %p1779_p1 = scmp.lt.s32.totalorder %s263_s28, %s263_s28 }
  0x31   : > { %p1772_p0 = scmp.ne.s32.totalorder %s263_s28, %s1771_s21  ;;  %p1780_p11 = scmp.lt.s32.totalorder %s1771_s21, %s1771_s21 }
  0x33   : > { %p1774_p4 = pnand %p1772_p0, %p1760_p7  ;;  %p1781_p3 = por %p1780_p11, %p1779_p1 }
  0x35   : > { %p1775_p2 = pneg %p1774_p4 }
  0x37   : > { %p1782_p10 = pnand %p1781_p3, %p1775_p2 }
  0x39   : > { %1785 = shalt.err (!%p1782_p10)
}
  0x3a   : > { %s1898_s27 = smov 64   ;;  %s1899_s30 = smov 4  }
  0x3b   : > { %1581 = dma.hbm_to_vmem [thread:$0]  (!%p2024_p5), %s2372_s7, 1024, %s263_s28, [#allocation7], %s1898_s27, %s1898_s27, %s1899_s30  }
  0x3c   : > { %p1400_p6 = scmp.ge.s32.totalorder %s1874_s16, 2 }
  0x3d   : > { %p2384_p7 = scmp.ne.s32.totalorder (!%p1400_p6), %s2379_s23, 0 }
  0x3e   : > { %275 = sbr.rel (%p1400_p6) target bundleno = 83 (0x53), region = 40 }
  0x45   : > { %278 = sbr.rel (!%p2384_p7) target bundleno = 83 (0x53), region = 44  ;;  %s280_s11 = sand.u32 (%p2384_p7), 1, %s1870_s0  }
  0x46   : > { %s1482_s13 = sshll.u32 (%p2384_p7), %s1874_s16, 3  ;;  %s1401_s18 = sshll.u32 (%p2384_p7), %s280_s11, 6 }
  0x47   : > { %s2385_s1 = sld [smem:[#allocation13_spill]] (%p2384_p7)  ;;  %s282_s28 = scalar_lea.vmem (%p2384_p7), [#allocation5], %s1401_s18 }
  0x4d   : > { %s285_s29 = scalar_lea.vmem %s2385_s1, %s1482_s13 }
  0x4e   : > { %v301_v0 = vld [vmem:[%s285_s29] sm:$0xff]   ;;  %v305_v1 = vld [vmem:[%s285_s29 + $0x10] sm:$0xff]  }
  0x4f   : > { %v309_v2 = vld [vmem:[%s285_s29 + $0x20] sm:$0xff]   ;;  %302 = vst [vmem:[%s282_s28] sm:$0xff] %v301_v0   ;;  %306 = vst [vmem:[%s282_s28 + $0x8] sm:$0xff] %v305_v1   ;;  %v313_v3 = vld [vmem:[%s285_s29 + $0x30] sm:$0xff]  }
  0x50   : > { %310 = vst [vmem:[%s282_s28 + $0x10] sm:$0xff] %v309_v2   ;;  %v317_v4 = vld [vmem:[%s285_s29 + $0x40] sm:$0xff]   ;;  %v321_v5 = vld [vmem:[%s285_s29 + $0x50] sm:$0xff]   ;;  %314 = vst [vmem:[%s282_s28 + $0x18] sm:$0xff] %v313_v3  }
  0x51   : > { %318 = vst [vmem:[%s282_s28 + $0x20] sm:$0xff] %v317_v4   ;;  %322 = vst [vmem:[%s282_s28 + $0x28] sm:$0xff] %v321_v5   ;;  %v325_v6 = vld [vmem:[%s285_s29 + $0x60] sm:$0xff]   ;;  %v329_v7 = vld [vmem:[%s285_s29 + $0x70] sm:$0xff]  }
  0x52   : > { %326 = vst [vmem:[%s282_s28 + $0x30] sm:$0xff] %v325_v6   ;;  %330 = vst [vmem:[%s282_s28 + $0x38] sm:$0xff] %v329_v7  }
  0x53 PF: > { %p2386_p10 = scmp.ne.s32.totalorder %s2382_s26, 0 }
  0x54   : > { %s2057_s23 = sand.u32 (!%p2386_p10), 1, %s1866_s15   ;;  %p2387_p11 = scmp.eq.s32.totalorder (!%p2386_p10), %s1983_s17, 0 }
  0x55   : > { %399 = sbr.rel (%p2386_p10) target bundleno = 920 (0x398), region = 89  ;;  %s1405_s27 = sshll.u32 (!%p2386_p10), %s2057_s23, 6 }
  0x56   : > { %s2060_s30 = scalar_lea.vmem (!%p2386_p10), [#allocation5], %s1405_s27 }
  0x5c   : > { %1853 = dma.done.wait (%p2387_p11), [#allocation7], 1024   ;;  %p2388_p1 = pmov %p2387_p11 }
  0x5d   : > { %s1408_s10 = sshll.u32 %s1983_s17, 1  ;;  %s2069_s26 = sld [smem:[#allocation4 + %s1983_s17]]  ;;  %v1900_v8 = vmov 0   ;;  %v2081_v11 = vld [vmem:[%s2370_s5] ss:$0 sm:$0xff]  ;;  %vm546_vm0 = vcmask 130048   ;;  %v475_v23 = vlaneseq }
  0x5e   : > { %1855 = vsyncadd (%p2388_p1), [#allocation7], 4294966272  ;;  %p446_p2 = scmp.lt.s32.totalorder %s1408_s10, 3  ;;  %603 = vmatprep.mubr.bf16.mxu0 %v1900_v8  ;;  %663 = vmatprep.mubr.bf16.mxu1 %v1900_v8  ;;  %v1673_v12 = vld [vmem:[%s2367_s2 + $0x4] ss:$12 sps:$4 sm:$0xff]   ;;  %v1679_v17 = vld [vmem:[%s2060_s30 + $0x8] sm:$0xff]  }
  0x5f   : > { %v1675_v13 = vld [vmem:[%s2367_s2] ss:$12 sps:$4 sm:$0xff]   ;;  %571 = vmatprep.subr.bf16.mxu0 %v1673_v12  ;;  %1570 = vmatprep.subr.bf16.mxu1 %v1673_v12  ;;  %v1677_v15 = vld [vmem:[%s2060_s30 + $0x30] sm:$0xff]   ;;  %v1680_v18 = vld [vmem:[%s2060_s30 + $0x38] sm:$0xff]   ;;  %v476_v24 = vshrl.u32 %v475_v23, 7 }
  0x60   : > { %s2401_s10 = smov (!%p446_p2, %s1408_s10), 3  ;;  %v1676_v14 = vld [vmem:[%s2060_s30] sm:$0xff]   ;;  %572 = vmatpush1.bf16.msra.mxu0 %v1675_v13  ;;  %1571 = vmatpush1.bf16.msra.mxu1 %v1675_v13  ;;  %v1678_v16 = vld [vmem:[%s2367_s2 + $0x8] ss:$12 sps:$4 sm:$0xff]   ;;  %v1682_v20 = vld [vmem:[%s2060_s30 + $0x18] sm:$0xff]  }
  0x61   : > { %s1409_s11 = sshll.u32 %s2401_s10, 3  ;;  %1512 = vmatprep.subr.bf16.mxu1 %v1678_v16  ;;  %v1681_v19 = vld [vmem:[%s2060_s30 + $0x10] sm:$0xff]   ;;  %v1683_v21 = vld [vmem:[%s2060_s30 + $0x20] sm:$0xff]   ;;  %v1684_v22 = vld [vmem:[%s2060_s30 + $0x28] sm:$0xff]   ;;  %v477_v25 = vsub.s32 0, %v476_v24  ;;  %v481_v27 = vsub.s32 1, %v476_v24 }
  0x62   : > { %s449_s20 = scalar_lea.vmem %s2371_s6, %s1409_s11  ;;  %v473_v26 = vld [vmem:[%s2369_s4] sm:$0x7]  ;;  %v485_v56 = vsub.s32 2, %v476_v24  ;;  %s2389_s30 = sshll.u32 %s2057_s23, 4 }
  0x63   : > { %v2074_v9 = vld [vmem:[%s449_s20] sm:$0xff]  ;;  %v2076_v10 = vld [vmem:[%s449_s20 + $0x8] sm:$0xff]  ;;  %1421 = vmatmul.mubr.msk.bf16.vlgmr.msra.gmra.mrb[0].mxu0 %vm546_vm0, %v1676_v14  ;;  %1427 = vmatmul.mubr.msk.bf16.vlgmr.msra.gmra.mrb[0].mxu1 %vm546_vm0, %v1677_v15  ;;  %v2119_v28 = vrot.slane %v473_v26, %v477_v25  ;;  %v2121_v31 = vrot.slane %v473_v26, %v481_v27  ;;  %s2175_s13 = scalar_lea.vmem [#allocation9], %s2389_s30  ;;  %p1438_p3 = scmp.le.s32.totalorder %s2069_s26, 0 }
  0x64   : > { %613 = vmatprep.mubr.bf16.mxu0 %v1900_v8  ;;  %1513 = vmatpush3.bf16.msra.mxu1 %v1678_v16  ;;  %v2139_v7 = vrot.slane %v473_v26, %v485_v56  ;;  %s2186_s18 = smov (!%p1438_p3), 0  }
  0x65   : > { %673 = vmatprep.mubr.bf16.mxu1 %v1900_v8 }
  0x6b   : > { %1422 = vmatmul.mubr.msk.bf16.gmra.mrb[4].mxu0 %vm546_vm0, %v1679_v17  ;;  %1428 = vmatmul.mubr.msk.bf16.gmra.mrb[4].mxu1 %vm546_vm0, %v1680_v18 }
  0x6c   : > { %623 = vmatprep.mubr.bf16.mxu0 %v1900_v8  ;;  %1514 = vmatprep.mubr.msk.bf16.mxu1 %vm546_vm0, %v1676_v14 }
  0x73   : > { %1423 = vmatmul.mubr.msk.bf16.gmra.mrb[8].mxu0 %vm546_vm0, %v1681_v19  ;;  %1515 = vmatmul.mubr.msk.bf16.vlgmr.msra.gmra.mrb[8].mxu1 %vm546_vm0, %v1679_v17 }
  0x74   : > { %633 = vmatprep.mubr.bf16.mxu0 %v1900_v8  ;;  %1518 = vmatprep.mubr.msk.bf16.mxu1 %vm546_vm0, %v1681_v19 }
  0x7b   : > { %1424 = vmatmul.mubr.msk.bf16.gmra.mrb[12].mxu0 %vm546_vm0, %v1682_v20  ;;  %1519 = vmatmul.mubr.msk.bf16.gmra.mrb[12].mxu1 %vm546_vm0, %v1682_v20 }
  0x7c   : > { %643 = vmatprep.mubr.bf16.mxu0 %v1900_v8  ;;  %1522 = vmatprep.mubr.msk.bf16.mxu1 %vm546_vm0, %v1683_v21 }
  0x83   : > { %1425 = vmatmul.mubr.msk.bf16.gmra.mrb[16].mxu0 %vm546_vm0, %v1683_v21  ;;  %1523 = vmatmul.mubr.msk.bf16.gmra.mrb[16].mxu1 %vm546_vm0, %v1684_v22 }
  0x84   : > { %653 = vmatprep.mubr.bf16.mxu0 %v1900_v8  ;;  %1526 = vmatprep.mubr.msk.bf16.mxu1 %vm546_vm0, %v1677_v15 }
  0x8b   : > { %1426 = vmatmul.mubr.msk.bf16.gmra.mrb[20].mxu0 %vm546_vm0, %v1684_v22  ;;  %1527 = vmatmul.mubr.msk.bf16.gmra.mrb[20].mxu1 %vm546_vm0, %v1680_v18 }
 0x136   : > { %v605_v29 = vpop.f32.mrb[0].mxu0  ;;  %v665_v30 = vpop.f32.mrb[0].mxu1 }
 0x137   : > { %v607_v32 = vpop.f32.mrb[1].mxu0  ;;  %v667_v33 = vpop.f32.mrb[1].mxu1  ;;  %v606_v36 = vadd.f32 %v605_v29, %v2119_v28  ;;  %v666_v37 = vadd.f32 %v665_v30, %v2119_v28 }
 0x138   : > { %v609_v34 = vpop.f32.mrb[2].mxu0  ;;  %v669_v35 = vpop.f32.mrb[2].mxu1  ;;  %v608_v42 = vadd.f32 %v607_v32, %v2121_v31  ;;  %v668_v43 = vadd.f32 %v667_v33, %v2121_v31 }
 0x139   : > { %v610_v38 = vadd.f32 %v609_v34, %v2119_v28  ;;  %v670_v39 = vadd.f32 %v669_v35, %v2119_v28  ;;  %v611_v40 = vpop.f32.mrb[3].mxu0  ;;  %v671_v41 = vpop.f32.mrb[3].mxu1 }
 0x13a   : > { %v612_v44 = vadd.f32 %v611_v40, %v2121_v31  ;;  %v672_v45 = vadd.f32 %v671_v41, %v2121_v31 }
 0x13b   : > { %v781_v46 = vpack.c.bf16 %v610_v38, %v606_v36  ;;  %v799_v47 = vpack.c.bf16 %v670_v39, %v666_v37 }
 0x13c   : > { %v782_v48 = vpack.c.bf16 %v612_v44, %v608_v42  ;;  %v800_v49 = vpack.c.bf16 %v672_v45, %v668_v43 }
 0x13d   : > { %805 = vst [vmem:[#allocation2] sm:$0xff] %v781_v46  ;;  %823 = vst [vmem:[#allocation2 + $0x90] sm:$0xff] %v799_v47 }
 0x13e   : > { %806 = vst [vmem:[#allocation2 + $0x8] sm:$0xff] %v782_v48  ;;  %824 = vst [vmem:[#allocation2 + $0x98] sm:$0xff] %v800_v49  ;;  %v615_v50 = vpop.f32.mrb[4].mxu0  ;;  %v675_v51 = vpop.f32.mrb[4].mxu1 }
 0x13f   : > { %v617_v52 = vpop.f32.mrb[5].mxu0  ;;  %v677_v53 = vpop.f32.mrb[5].mxu1  ;;  %v616_v57 = vadd.f32 %v615_v50, %v2119_v28  ;;  %v676_v58 = vadd.f32 %v675_v51, %v2119_v28 }
 0x140   : > { %v619_v54 = vpop.f32.mrb[6].mxu0  ;;  %v679_v55 = vpop.f32.mrb[6].mxu1  ;;  %v618_v63 = vadd.f32 %v617_v52, %v2121_v31  ;;  %v678_v0 = vadd.f32 %v677_v53, %v2121_v31 }
 0x141   : > { %v620_v59 = vadd.f32 %v619_v54, %v2119_v28  ;;  %v680_v60 = vadd.f32 %v679_v55, %v2119_v28  ;;  %v621_v61 = vpop.f32.mrb[7].mxu0  ;;  %v681_v62 = vpop.f32.mrb[7].mxu1 }
 0x142   : > { %v622_v1 = vadd.f32 %v621_v61, %v2121_v31  ;;  %v682_v2 = vadd.f32 %v681_v62, %v2121_v31 }
 0x143   : > { %v784_v3 = vpack.c.bf16 %v620_v59, %v616_v57  ;;  %v802_v4 = vpack.c.bf16 %v680_v60, %v676_v58 }
 0x144   : > { %v785_v5 = vpack.c.bf16 %v622_v1, %v618_v63  ;;  %v803_v6 = vpack.c.bf16 %v682_v2, %v678_v0 }
 0x145   : > { %808 = vst [vmem:[#allocation2 + $0x18] sm:$0xff] %v784_v3  ;;  %826 = vst [vmem:[#allocation2 + $0xa8] sm:$0xff] %v802_v4 }
 0x146   : > { %809 = vst [vmem:[#allocation2 + $0x20] sm:$0xff] %v785_v5  ;;  %827 = vst [vmem:[#allocation2 + $0xb0] sm:$0xff] %v803_v6  ;;  %v625_v8 = vpop.f32.mrb[8].mxu0  ;;  %v1516_v12 = vpop.f32.mrb[8].mxu1 }
 0x147   : > { %v627_v13 = vpop.f32.mrb[9].mxu0  ;;  %v718_v14 = vpop.f32.mrb[9].mxu1  ;;  %v626_v17 = vadd.f32 %v625_v8, %v2119_v28  ;;  %v727_v18 = vadd.f32 %v1516_v12, %v2139_v7 }
 0x148   : > { %v629_v15 = vpop.f32.mrb[10].mxu0  ;;  %v1517_v16 = vpop.f32.mrb[10].mxu1  ;;  %v628_v23 = vadd.f32 %v627_v13, %v2121_v31  ;;  %v719_v24 = vadd.f32 %v718_v14, %v2139_v7 }
 0x149   : > { %v630_v19 = vadd.f32 %v629_v15, %v2119_v28  ;;  %v730_v20 = vadd.f32 %v1517_v16, %v2139_v7  ;;  %v631_v21 = vpop.f32.mrb[11].mxu0  ;;  %v721_v22 = vpop.f32.mrb[11].mxu1 }
 0x14a   : > { %v632_v25 = vadd.f32 %v631_v21, %v2121_v31  ;;  %v722_v26 = vadd.f32 %v721_v22, %v2139_v7 }
 0x14b   : > { %v787_v27 = vpack.c.bf16 %v630_v19, %v626_v17  ;;  %v786_v29 = vpack.c.bf16 %v730_v20, %v727_v18 }
 0x14c   : > { %v788_v30 = vpack.c.bf16 %v632_v25, %v628_v23  ;;  %v783_v32 = vpack.c.bf16 %v722_v26, %v719_v24 }
 0x14d   : > { %811 = vst [vmem:[#allocation2 + $0x30] sm:$0xff] %v787_v27  ;;  %810 = vst [vmem:[#allocation2 + $0x28] sm:$0xff] %v786_v29 }
 0x14e   : > { %812 = vst [vmem:[#allocation2 + $0x38] sm:$0xff] %v788_v30  ;;  %807 = vst [vmem:[#allocation2 + $0x10] sm:$0xff] %v783_v32  ;;  %v635_v33 = vpop.f32.mrb[12].mxu0  ;;  %v1520_v34 = vpop.f32.mrb[12].mxu1 }
 0x14f   : > { %v637_v35 = vpop.f32.mrb[13].mxu0  ;;  %v734_v36 = vpop.f32.mrb[13].mxu1  ;;  %v636_v39 = vadd.f32 %v635_v33, %v2119_v28  ;;  %v743_v40 = vadd.f32 %v1520_v34, %v2139_v7 }
 0x150   : > { %v639_v37 = vpop.f32.mrb[14].mxu0  ;;  %v1521_v38 = vpop.f32.mrb[14].mxu1  ;;  %v638_v45 = vadd.f32 %v637_v35, %v2121_v31  ;;  %v735_v46 = vadd.f32 %v734_v36, %v2139_v7  ;;  %v2180_v35 = vmov 0.0  }
 0x151   : > { %v640_v41 = vadd.f32 %v639_v37, %v2119_v28  ;;  %v746_v42 = vadd.f32 %v1521_v38, %v2139_v7  ;;  %v641_v43 = vpop.f32.mrb[15].mxu0  ;;  %v737_v44 = vpop.f32.mrb[15].mxu1 }
 0x152   : > { %v642_v47 = vadd.f32 %v641_v43, %v2121_v31  ;;  %v738_v48 = vadd.f32 %v737_v44, %v2139_v7 }
 0x153   : > { %v790_v49 = vpack.c.bf16 %v640_v41, %v636_v39  ;;  %v792_v50 = vpack.c.bf16 %v746_v42, %v743_v40 }
 0x154   : > { %v791_v51 = vpack.c.bf16 %v642_v47, %v638_v45  ;;  %v789_v52 = vpack.c.bf16 %v738_v48, %v735_v46 }
 0x155   : > { %814 = vst [vmem:[#allocation2 + $0x48] sm:$0xff] %v790_v49  ;;  %816 = vst [vmem:[#allocation2 + $0x58] sm:$0xff] %v792_v50 }
 0x156   : > { %815 = vst [vmem:[#allocation2 + $0x50] sm:$0xff] %v791_v51  ;;  %813 = vst [vmem:[#allocation2 + $0x40] sm:$0xff] %v789_v52  ;;  %v645_v53 = vpop.f32.mrb[16].mxu0  ;;  %v1524_v54 = vpop.f32.mrb[16].mxu1 }
 0x157   : > { %v647_v55 = vpop.f32.mrb[17].mxu0  ;;  %v750_v56 = vpop.f32.mrb[17].mxu1  ;;  %v646_v59 = vadd.f32 %v645_v53, %v2119_v28  ;;  %v759_v60 = vadd.f32 %v1524_v54, %v2139_v7 }
 0x158   : > { %v649_v57 = vpop.f32.mrb[18].mxu0  ;;  %v1525_v58 = vpop.f32.mrb[18].mxu1  ;;  %v648_v1 = vadd.f32 %v647_v55, %v2121_v31  ;;  %v751_v2 = vadd.f32 %v750_v56, %v2139_v7 }
 0x159   : > { %v650_v61 = vadd.f32 %v649_v57, %v2119_v28  ;;  %v762_v62 = vadd.f32 %v1525_v58, %v2139_v7  ;;  %v651_v63 = vpop.f32.mrb[19].mxu0  ;;  %v753_v0 = vpop.f32.mrb[19].mxu1 }
 0x15a   : > { %v652_v3 = vadd.f32 %v651_v63, %v2121_v31  ;;  %v754_v4 = vadd.f32 %v753_v0, %v2139_v7 }
 0x15b   : > { %v793_v5 = vpack.c.bf16 %v650_v61, %v646_v59  ;;  %v798_v6 = vpack.c.bf16 %v762_v62, %v759_v60 }
 0x15c   : > { %v794_v8 = vpack.c.bf16 %v652_v3, %v648_v1  ;;  %v795_v12 = vpack.c.bf16 %v754_v4, %v751_v2 }
 0x15d   : > { %817 = vst [vmem:[#allocation2 + $0x60] sm:$0xff] %v793_v5  ;;  %822 = vst [vmem:[#allocation2 + $0x88] sm:$0xff] %v798_v6 }
 0x15e   : > { %818 = vst [vmem:[#allocation2 + $0x68] sm:$0xff] %v794_v8  ;;  %819 = vst [vmem:[#allocation2 + $0x70] sm:$0xff] %v795_v12  ;;  %v655_v13 = vpop.f32.mrb[20].mxu0  ;;  %v1528_v14 = vpop.f32.mrb[20].mxu1 }
 0x15f   : > { %v657_v15 = vpop.f32.mrb[21].mxu0  ;;  %v766_v16 = vpop.f32.mrb[21].mxu1  ;;  %v656_v19 = vadd.f32 %v655_v13, %v2119_v28  ;;  %v775_v20 = vadd.f32 %v1528_v14, %v2139_v7 }
 0x160   : > { %v659_v17 = vpop.f32.mrb[22].mxu0  ;;  %v1529_v18 = vpop.f32.mrb[22].mxu1  ;;  %v658_v25 = vadd.f32 %v657_v15, %v2121_v31  ;;  %v767_v26 = vadd.f32 %v766_v16, %v2139_v7  ;;  %1354 = sbr.rel (%p1438_p3) target bundleno = 656 (0x290), region = 143 }
 0x161   : > { %v660_v21 = vadd.f32 %v659_v17, %v2119_v28  ;;  %v778_v22 = vadd.f32 %v1529_v18, %v2139_v7  ;;  %v661_v23 = vpop.f32.mrb[23].mxu0  ;;  %v769_v24 = vpop.f32.mrb[23].mxu1  ;;  %v2178_v28 = vmov 0.0  }
 0x162   : > { %v662_v27 = vadd.f32 %v661_v23, %v2121_v31  ;;  %v770_v29 = vadd.f32 %v769_v24, %v2139_v7  ;;  %v2182_v31 = vmov (!%p1438_p3), 0.0   ;;  %v2184_v7 = vmov (!%p1438_p3), 0.0  }
 0x163   : > { %v796_v30 = vpack.c.bf16 %v660_v21, %v656_v19  ;;  %v804_v32 = vpack.c.bf16 %v778_v22, %v775_v20 }
 0x164   : > { %v797_v33 = vpack.c.bf16 %v662_v27, %v658_v25  ;;  %v801_v34 = vpack.c.bf16 %v770_v29, %v767_v26 }
 0x165   : > { %820 = vst [vmem:[#allocation2 + $0x78] sm:$0xff] %v796_v30  ;;  %828 = vst [vmem:[#allocation2 + $0xb8] sm:$0xff] %v804_v32 }
 0x166   : > { %821 = vst [vmem:[#allocation2 + $0x80] sm:$0xff] %v797_v33  ;;  %825 = vst [vmem:[#allocation2 + $0xa0] sm:$0xff] %v801_v34 }
 0x167 LB: >> { %v1686_v36 = vld [vmem:[%s2368_s3 + $0x4] ss:$12 sps:$4 sm:$0xff]   ;;  %v1688_v37 = vld [vmem:[%s2368_s3] ss:$12 sps:$4 sm:$0xff]   ;;  %v1901_v38 = vmov 0.0   ;;  %v1902_v39 = vmov 0   ;;  %v1148_v41 = vstv %s1886_s18  ;;  %v859_v63 = vpack.c.bf16 %v1878_v31, %v1882_v7  ;;  %s1886_s18 = sphi %s2186_s18, %s842_s18   ;;  %v1882_v7 = vphi %v2184_v7, %v2391_v7   ;;  %v1878_v31 = vphi %v2182_v31, %v2390_v31  }
 0x168   : >> { %1530 = vmatprep.subr.bf16.mxu1 %v1901_v38  ;;  %1052 = vmatprep.mubr.bf16.mxu0 %v1902_v39  ;;  %v1689_v40 = vld [vmem:[%s2368_s3 + $0x1c] ss:$12 sps:$4 sm:$0xff]   ;;  %vm1903_vm1 = vmmov 0   ;;  %v1691_v42 = vld [vmem:[%s2368_s3 + $0x18] ss:$12 sps:$4 sm:$0xff]   ;;  %vm1149_vm2 = vcmp.gt.s32.totalorder %v2074_v9, %v1148_v41  ;;  %vm1150_vm3 = vcmp.gt.s32.totalorder %v2076_v10, %v1148_v41  ;;  %s1483_s12 = smul.u32 24, %s1886_s18 }
 0x169   : >> { %1020 = vmatprep.subr.bf16.mxu0 %v1686_v36  ;;  %1546 = vmatprep.mubr.msk.bf16.mxu1 %vm1903_vm1, %v1901_v38  ;;  %v1692_v43 = vld [vmem:[%s2368_s3 + $0x34] ss:$12 sps:$4 sm:$0xff]   ;;  %v1151_v44 = vsel %vm1149_vm2, 1, %v1902_v39  ;;  %v1152_v45 = vsel %vm1150_vm3, 1, %v1902_v39  ;;  %v1694_v46 = vld [vmem:[%s2368_s3 + $0x30] ss:$12 sps:$4 sm:$0xff]  }
 0x16a   : >> { %1021 = vmatpush1.bf16.msra.mxu0 %v1688_v37  ;;  %1685 = vset.pattern.permute.xlu0 %v1902_v39  ;;  %v1695_v47 = vld [vmem:[%s2368_s3 + $0x4c] ss:$12 sps:$4 sm:$0xff]   ;;  %v1706_v48 = vld [vmem:[%s2368_s3 + $0x8] ss:$12 sps:$4 sm:$0xff]   ;;  %v1698_v50 = vld [vmem:[%s2368_s3 + $0x64] ss:$12 sps:$4 sm:$0xff]  }
 0x16b   : >> { %1022 = vmatprep.subr.bf16.mxu0 %v1689_v40  ;;  %1154 = vperm.xlu0 %1685, %v1151_v44   ;;  %v1697_v49 = vld [vmem:[%s2368_s3 + $0x48] ss:$12 sps:$4 sm:$0xff]   ;;  %v1710_v51 = vld [vmem:[%s2368_s3 + $0x20] ss:$12 sps:$4 sm:$0xff]   ;;  %v1712_v53 = vld [vmem:[%s2368_s3 + $0x38] ss:$12 sps:$4 sm:$0xff]  }
 0x16c   : >> { %1531 = vmatpush3.bf16.msra.mxu1 %v1706_v48  ;;  %v1700_v52 = vld [vmem:[%s2368_s3 + $0x60] ss:$12 sps:$4 sm:$0xff]   ;;  %v1701_v54 = vld [vmem:[%s2368_s3 + $0x7c] ss:$12 sps:$4 sm:$0xff]   ;;  %v1703_v55 = vld [vmem:[%s2368_s3 + $0x78] ss:$12 sps:$4 sm:$0xff]  }
 0x16d   : >> { %1532 = vmatprep.subr.bf16.mxu1 %v1901_v38  ;;  %v1713_v56 = vld [vmem:[%s2368_s3 + $0x50] ss:$12 sps:$4 sm:$0xff]   ;;  %v1704_v57 = vld [vmem:[%s2368_s3 + $0x94] ss:$12 sps:$4 sm:$0xff]   ;;  %v1708_v60 = vld [vmem:[%s2368_s3 + $0xac] ss:$12 sps:$4 sm:$0xff]  }
 0x16e   : >> { %1023 = vmatpush1.bf16.msra.mxu0 %v1691_v42  ;;  %v1707_v58 = vld [vmem:[%s2368_s3 + $0x90] ss:$12 sps:$4 sm:$0xff]   ;;  %v1714_v59 = vld [vmem:[%s2368_s3 + $0x68] ss:$12 sps:$4 sm:$0xff]   ;;  %v1715_v62 = vld [vmem:[%s2368_s3 + $0x80] ss:$12 sps:$4 sm:$0xff]  }
 0x16f   : >> { %1024 = vmatprep.subr.bf16.mxu0 %v1692_v43  ;;  %1157 = vperm.xlu0 %1685, %v1152_v45   ;;  %v1711_v61 = vld [vmem:[%s2368_s3 + $0xa8] ss:$12 sps:$4 sm:$0xff]   ;;  %v1716_v0 = vld [vmem:[%s2368_s3 + $0x98] ss:$12 sps:$4 sm:$0xff]   ;;  %v1717_v1 = vld [vmem:[%s2368_s3 + $0xb0] ss:$12 sps:$4 sm:$0xff]  }
 0x170   : >> { %1533 = vmatpush3.bf16.msra.mxu1 %v1710_v51  ;;  %s2284_s30 = scalar_lea.vmem [#allocation2], %s1483_s12  ;;  %s842_s18 = sadd.s32 1, %s1886_s18  }
 0x171   : >> { %1534 = vmatprep.subr.bf16.mxu1 %v1901_v38  ;;  %v850_v2 = vld [vmem:[%s2284_s30] sm:$0xff]  ;;  %v851_v3 = vld [vmem:[%s2284_s30 + $0x8] sm:$0xff]  ;;  %v852_v35 = vld [vmem:[%s2284_s30 + $0x10] sm:$0xff]  ;;  %p841_p5 = scmp.ge.s32.totalorder %s842_s18, %s2069_s26 }
 0x172   : >> { %1025 = vmatpush1.bf16.msra.mxu0 %v1694_v46  ;;  %v853_v4 = vunpack.c.l.bf16 %v850_v2  ;;  %v854_v5 = vunpack.c.l.bf16 %v851_v3  ;;  %v856_v6 = vunpack.c.h.bf16 %v850_v2  ;;  %v857_v12 = vunpack.c.h.bf16 %v851_v3 }
 0x173   : >> { %1026 = vmatprep.subr.bf16.mxu0 %v1695_v47  ;;  %v855_v39 = vunpack.c.l.bf16 %v852_v35  ;;  %v858_v42 = vunpack.c.h.bf16 %v852_v35 }
 0x174   : >> { %1535 = vmatpush3.bf16.msra.mxu1 %v1712_v53 }
 0x175   : >> { %1536 = vmatprep.subr.bf16.mxu1 %v1901_v38 }
 0x176   : >> { %1027 = vmatpush1.bf16.msra.mxu0 %v1697_v49 }
 0x177   : >> { %1028 = vmatprep.subr.bf16.mxu0 %v1698_v50 }
 0x178   : >> { %1537 = vmatpush3.bf16.msra.mxu1 %v1713_v56 }
 0x179   : >> { %1538 = vmatprep.subr.bf16.mxu1 %v1901_v38 }
 0x17a   : >> { %1029 = vmatpush1.bf16.msra.mxu0 %v1700_v52 }
 0x17b   : >> { %1030 = vmatprep.subr.bf16.mxu0 %v1701_v54 }
 0x17c   : >> { %1539 = vmatpush3.bf16.msra.mxu1 %v1714_v59 }
 0x17d   : >> { %1540 = vmatprep.subr.bf16.mxu1 %v1901_v38 }
 0x17e   : >> { %1031 = vmatpush1.bf16.msra.mxu0 %v1703_v55 }
 0x17f   : >> { %1032 = vmatprep.subr.bf16.mxu0 %v1704_v57 }
 0x180   : >> { %1541 = vmatpush3.bf16.msra.mxu1 %v1715_v62 }
 0x181   : >> { %1542 = vmatprep.subr.bf16.mxu1 %v1901_v38 }
 0x182   : >> { %1033 = vmatpush1.bf16.msra.mxu0 %v1707_v58 }
 0x183   : >> { %1034 = vmatprep.subr.bf16.mxu0 %v1708_v60 }
 0x184   : >> { %1543 = vmatpush3.bf16.msra.mxu1 %v1716_v0 }
 0x185   : >> { %1544 = vmatprep.subr.bf16.mxu1 %v1901_v38 }
 0x186   : >> { %1035 = vmatpush1.bf16.msra.mxu0 %v1711_v61 }
 0x188   : >> { %1545 = vmatpush3.bf16.msra.mxu1 %v1717_v1 }
 0x189   : >> { %1053 = vmatmul.mubr.bf16.vlgmr.msra.gmra.mrb[0].mxu0 %v859_v63 }
 0x18b   : >> { %1547 = vmatmul.mubr.bf16.vlgmr.msra.gmra.mrb[0].mxu1 %v859_v63 }
 0x1ea   : >> { %v1155_v49 = vpop.permute.xlu0 %1154 }
 0x1eb   : >> { %vm1159_vm4 = vcmp.eq.s32.totalorder %v1155_v49, 1 }
 0x1ee   : >> { %v1158_v58 = vpop.permute.xlu0 %1157 }
 0x1ef   : >> { %vm1160_vm5 = vcmp.eq.s32.totalorder %v1158_v58, 1 }
 0x25c   : >> { %v1054_v8 = vpop.f32.mrb[0].mxu0 }
 0x25d   : >> { %v1104_v13 = vadd.f32 %v1054_v8, %v853_v4  ;;  %v1056_v14 = vpop.f32.mrb[1].mxu0 }
 0x25e   : >> { %v1105_v15 = vadd.f32 %v1056_v14, %v854_v5  ;;  %v1058_v16 = vpop.f32.mrb[2].mxu0  ;;  %v1097_v23 = vpop.f32.mrb[0].mxu1 }
 0x25f   : >> { %v1464_v17 = vmul.f32 -1.442695, %v1104_v13  ;;  %v1106_v18 = vadd.f32 %v1058_v16, %v856_v6  ;;  %v1060_v19 = vpop.f32.mrb[3].mxu0  ;;  %v1548_v24 = vpop.f32.mrb[1].mxu1  ;;  %v1132_v37 = vadd.f32 %v2081_v11, %v1097_v23 }
 0x260   : >> { %v1107_v20 = vadd.f32 %v1060_v19, %v857_v12  ;;  %v1465_v22 = vmul.f32 -1.442695, %v1105_v15  ;;  %v1100_v26 = vpop.f32.mrb[2].mxu1 }
 0x261   : >> { %1718 = vpow2.f32 %v1464_v17  ;;  %v1466_v21 = vmul.f32 -1.442695, %v1106_v18  ;;  %v1549_v27 = vpop.f32.mrb[3].mxu1  ;;  %v1133_v43 = vadd.f32 %v2081_v11, %v1100_v26 }
 0x262   : >> { %v1467_v25 = vmul.f32 -1.442695, %v1107_v20 }
 0x263   : >> { %1720 = vpow2.f32 %v1466_v21 }
 0x264   : >> { %1722 = vpow2.f32 %v1465_v22 }
 0x265   : >> { %1724 = vpow2.f32 %v1467_v25 }
 0x26b   : >> { %v1719_v29 = vpop.eup %1718 }
 0x26c   : >> { %v1120_v30 = vadd.f32 1.0, %v1719_v29 }
 0x26d   : >> { %v1721_v32 = vpop.eup %1720 }
 0x26e   : >> { %1726 = vrcp.f32 %v1120_v30  ;;  %v1122_v33 = vadd.f32 1.0, %v1721_v32  ;;  %v1723_v34 = vpop.eup %1722 }
 0x26f   : >> { %v1725_v28 = vpop.eup %1724  ;;  %v1121_v36 = vadd.f32 1.0, %v1723_v34 }
 0x270   : >> { %1728 = vrcp.f32 %v1122_v33  ;;  %v1123_v38 = vadd.f32 1.0, %v1725_v28 }
 0x271   : >> { %1730 = vrcp.f32 %v1121_v36 }
 0x272   : >> { %1732 = vrcp.f32 %v1123_v38 }
 0x278   : >> { %v1727_v40 = vpop.eup %1726 }
 0x279   : >> { %v1134_v41 = vmul.f32 %v1727_v40, %v1132_v37 }
 0x27a   : >> { %v1729_v44 = vpop.eup %1728 }
 0x27b   : >> { %v1136_v45 = vadd.f32 %v1134_v41, %v855_v39  ;;  %v1135_v46 = vmul.f32 %v1729_v44, %v1133_v43  ;;  %v1731_v48 = vpop.eup %1730 }
 0x27c   : >> { %v1733_v50 = vpop.eup %1732  ;;  %v1140_v51 = vsub.f32 1.0, %v1731_v48  ;;  %v1144_v54 = vmul.f32 %v1882_v7, %v1731_v48 }
 0x27d   : >> { %1734 = vtanh.f32 %v1136_v45  ;;  %v1137_v47 = vadd.f32 %v1135_v46, %v858_v42  ;;  %v1141_v55 = vsub.f32 1.0, %v1733_v50  ;;  %v1145_v60 = vmul.f32 %v1878_v31, %v1733_v50 }
 0x27f   : >> { %1736 = vtanh.f32 %v1137_v47 }
 0x287   : >> { %v1735_v52 = vpop.eup %1734 }
 0x288   : >> { %v1142_v53 = vmul.f32 %v1735_v52, %v1140_v51 }
 0x289   : >> { %v1737_v56 = vpop.eup %1736  ;;  %844 = sbr.rel (!%p841_p5) target bundleno = 359 (0x167), region = 149 }
 0x28a   : >> { %v1146_v57 = vadd.f32 %v1144_v54, %v1142_v53  ;;  %v1143_v59 = vmul.f32 %v1737_v56, %v1141_v55 }
 0x28c   : >> { %v1161_v61 = vsel %vm1159_vm4, %v1146_v57, %v1882_v7   ;;  %v1147_v62 = vadd.f32 %v1145_v60, %v1143_v59 }
 0x28d   : >> { %v2391_v7 = vmov %v1161_v61  ;;  %v2393_v35 = vmov (%p841_p5), %v1161_v61 }
 0x28e   : >> { %v1162_v63 = vsel %vm1160_vm5, %v1147_v62, %v1878_v31  }
 0x28f   : >> { %v2390_v31 = vmov %v1162_v63  ;;  %v2392_v28 = vmov (%p841_p5), %v1162_v63 }
 0x290 PF: > { %v1738_v7 = vld [vmem:[#allocation6] sm:$0xff]   ;;  %v1904_v0 = vmov 0.0   ;;  %v1739_v1 = vld [vmem:[#allocation6 + $0x8] sm:$0xff]   ;;  %vm1905_vm6 = vmmov 0   ;;  %v1740_v2 = vld [vmem:[#allocation6 + $0x10] sm:$0xff]   ;;  %v1163_v4 = vpack.c.bf16 %v1890_v28, %v1894_v35  ;;  %s1484_s20 = sshll.u32 %s1983_s17, 8  ;;  %v1894_v35 = vphi %v2180_v35, %v2393_v35   ;;  %v1890_v28 = vphi %v2178_v28, %v2392_v28  }
 0x291   : > { %1550 = vmatprep.subr.bf16.mxu0 %v1904_v0  ;;  %1566 = vmatprep.mubr.msk.bf16.mxu0 %vm1905_vm6, %v1904_v0  ;;  %v1741_v9 = vld [vmem:[#allocation6 + $0x18] sm:$0xff]   ;;  %v1742_v10 = vld [vmem:[#allocation6 + $0x20] sm:$0xff]   ;;  %v1743_v11 = vld [vmem:[#allocation6 + $0x28] sm:$0xff]   ;;  %s1292_s21 = sshll.u32 %s2175_s13, 4  ;;  %s2317_s27 = scalar_lea.hbm %s2374_s9, %s1484_s20  ;;  %s2319_s21 = int_to_ptr.vmem [resolvable:$true] %s1292_s21 }
 0x292   : > { %1551 = vmatpush3.bf16.msra.mxu0 %v1738_v7  ;;  %v1744_v31 = vld [vmem:[#allocation6 + $0x30] sm:$0xff]   ;;  %v1745_v3 = vld [vmem:[#allocation6 + $0x38] sm:$0xff]   ;;  %v1468_v5 = vld [vmem:[%s2373_s8] ss:$0 sm:$0xff]  ;;  %s1279_s17 = scalar_lea.sflag [#allocation8], %s2057_s23  ;;  %s1786_s10 = scalar_lea.vmem %s2319_s21, 256 }
 0x293   : > { %1552 = vmatprep.subr.bf16.mxu0 %v1904_v0  ;;  %p1787_p8 = scmp.ne.s32.totalorder %s2319_s21, %s1786_s10  ;;  %p2394_p9 = scmp.ne.s32.totalorder %s2380_s24, 0 }
 0x294   : > { %s1906_s11 = smov [#allocation9]  }
 0x295   : > { %p1788_p12 = pnand %p1787_p8, %p2394_p9  ;;  %s1790_s1 = sshll.u32 %s1906_s11, 4  ;;  %s1791_s1 = int_to_ptr.vmem [resolvable:$false] %s1790_s1 }
 0x296   : > { %1553 = vmatpush3.bf16.msra.mxu0 %v1739_v1  ;;  %s1792_s12 = scalar_lea.vmem %s1791_s1, 512  ;;  %p1793_p0 = scmp.lt.s32.totalorder %s2319_s21, %s1791_s1 }
 0x297   : > { %1554 = vmatprep.subr.bf16.mxu0 %v1904_v0  ;;  %p1789_p13 = pneg %p1788_p12  ;;  %p1794_p4 = scmp.lt.s32.totalorder %s1792_s12, %s1786_s10 }
 0x299   : > { %p1795_p7 = por %p1794_p4, %p1793_p0 }
 0x29a   : > { %1555 = vmatpush3.bf16.msra.mxu0 %v1740_v2 }
 0x29b   : > { %1556 = vmatprep.subr.bf16.mxu0 %v1904_v0  ;;  %p1796_p10 = pnand %p1795_p7, %p1789_p13 }
 0x29e   : > { %1557 = vmatpush3.bf16.msra.mxu0 %v1741_v9 }
 0x29f   : > { %1558 = vmatprep.subr.bf16.mxu0 %v1904_v0 }
 0x2a2   : > { %1559 = vmatpush3.bf16.msra.mxu0 %v1742_v10 }
 0x2a3   : > { %1560 = vmatprep.subr.bf16.mxu0 %v1904_v0 }
 0x2a6   : > { %1561 = vmatpush3.bf16.msra.mxu0 %v1743_v11 }
 0x2a7   : > { %1562 = vmatprep.subr.bf16.mxu0 %v1904_v0 }
 0x2aa   : > { %1563 = vmatpush3.bf16.msra.mxu0 %v1744_v31 }
 0x2ab   : > { %1564 = vmatprep.subr.bf16.mxu0 %v1904_v0 }
 0x2ae   : > { %1565 = vmatpush3.bf16.msra.mxu0 %v1745_v3 }
 0x2b1   : > { %1567 = vmatmul.mubr.bf16.vlgmr.msra.gmra.mrb[0].mxu0 %v1163_v4 }
 0x384   : > { %v1269_v6 = vpop.f32.mrb[0].mxu0 }
 0x385   : > { %v1270_v8 = vadd.f32 %v1468_v5, %v1269_v6  ;;  %v1568_v12 = vpop.f32.mrb[1].mxu0 }
 0x386   : > { %v1272_v13 = vpop.f32.mrb[2].mxu0 }
 0x387   : > { %1276 = vst [vmem:[%s2175_s13] sm:$0xff] %v1270_v8  ;;  %v1273_v14 = vadd.f32 %v1468_v5, %v1272_v13  ;;  %v1569_v15 = vpop.f32.mrb[3].mxu0 }
 0x389   : > { %1277 = vst [vmem:[%s2175_s13 + $0x8] sm:$0xff] %v1273_v14 }
 0x38a   : > { %1799 = shalt.err (!%p1796_p10)
}
 0x38b   : > { %s1800_s13 = scalar_lea.hbm %s2317_s27, 256  ;;  %s1804_s18 = scalar_lea.hbm %s2374_s9, 512 }
 0x38c   : > { %p1801_p11 = scmp.ne.s32.totalorder %s2317_s27, %s1800_s13  ;;  %p1805_p3 = scmp.lt.u32.totalorder %s2317_s27, %s2374_s9 }
 0x38d   : > { %p1806_p5 = scmp.lt.u32.totalorder %s1804_s18, %s1800_s13  ;;  %p1808_p12 = scmp.lt.u32.totalorder %s1800_s13, %s2317_s27 }
 0x38e   : > { %p1802_p1 = pnand %p1801_p11, %p2394_p9 }
 0x38f   : > { %p1807_p8 = por %p1806_p5, %p1805_p3 }
 0x390   : > { %p1803_p2 = pneg %p1802_p1 }
 0x391   : > { %p1809_p13 = por %p1808_p12, %p1807_p8 }
 0x393   : > { %p1810_p0 = pnand %p1809_p13, %p1803_p2 }
 0x395   : > { %1813 = shalt.err (!%p1810_p0)
}
 0x396   : > { %s1907_s28 = smov 128   ;;  %s1908_s10 = smov 8  }
 0x397   : > { %1576 = dma.vmem_to_hbm [thread:$0]  (%p2394_p9), %s2319_s21, 256, %s2317_s27, %s1279_s17, %s1907_s28, %s1907_s28, %s1908_s10  }
 0x398 PF: > { %s1307_s11 = sand.u32 1, %s1862_s14   ;;  %p2395_p4 = scmp.ne.s32.totalorder %s2381_s25, 0 }
 0x399   : > { %s1308_s1 = scalar_lea.sflag [#allocation8], %s1307_s11 }
 0x39a   : > { %p1583_p7 = pnand %p1400_p6, %p2395_p4 }
 0x39c   : > { %1857 = dma.done.wait (!%p1583_p7), %s1308_s1, 256  }
 0x39d   : > { %1859 = vsyncadd (!%p1583_p7), %s1308_s1, 4294967040  ;;  %p26_p10 = scmp.ge.s32.totalorder %s1987_s19, 4   ;;  %s2396_s14 = smov %s1866_s15 }
 0x39e   : > { %s2397_s15 = smov %s1870_s0  ;;  %s2398_s0 = smov %s1999_s22 }
 0x39f   : > { %s2399_s16 = smov %s1987_s19  ;;  %28 = sbr.rel (!%p26_p10) target bundleno = 19 (0x13), region = 160 }
 0x3a6   :  { %1313 = vsyncpa [#allocation7], 1 }
 0x3a7   :  { %1315 = vsyncpa [#allocation7 + $0x1], 1 }
 0x3a8   :  { %1316 = vsyncpa [#allocation8], 1 }
 0x3a9   :  { %1318 = vsyncpa [#allocation8 + $0x1], 1 }

</bundles_post_ra>
